<compile_context>
chip_gen: v5e
topology: v5e:2x2
jax: 0.10.0
libtpu: 0.0.40
codegen_flags: <defaults>
</compile_context>

<pallas_src>
import functools

import jax
import jax.numpy as jnp
from jax import lax
from jax.experimental import pallas as pl
from jax.experimental.pallas import tpu as pltpu

INPUT_SIZE = 30
HIDDEN_SIZE = 128
OUTPUT_SIZE = 2


def _round_up(n, m):
    return ((n + m - 1) // m) * m


def _num_tensorcores():
    """Best-effort TensorCores-per-chip (2 on v7x, 1 on v5e/v6e)."""
    try:
        kind = jax.devices()[0].device_kind.lower()
        return 2 if "v7" in kind else 1
    except Exception:  # pragma: no cover - defensive, e.g. no devices yet
        return 1


def _mlp_kernel(x_ref, w1_ref, b1_ref, w2t_ref, b2t_ref, ot_ref, *, mxu_dtype):
    # x:   (tb, 30)  f32 streamed from HBM (cast to mxu_dtype here, not in XLA)
    # w1:  (30, 128) mxu_dtype, b1: (1, 128) f32
    # w2t: (2, 128)  mxu_dtype, b2t: (2, 1) f32
    # ot:  (2, tb)   f32  -- output stored transposed (lane-dense last dim).
    x = x_ref[...].astype(mxu_dtype)          # in-kernel cast: bf16 MXU path,
    w1 = w1_ref[...]                          # zero extra HBM passes over x.
    h = jnp.dot(x, w1, preferred_element_type=jnp.float32) + b1_ref[...]
    h = jnp.maximum(h, 0.0)                   # ReLU in f32 on the VPU

    # Second projection computed directly in transposed form:
    #   o^T = w2^T @ h^T  ==  dot_general(w2t, h) contracting the last dims.
    # Any relayout/transpose of h this needs rides the otherwise-idle XLU slot;
    # keeping the result (2, tb) preserves lane-dense, unmasked output stores.
    ot = lax.dot_general(
        w2t_ref[...], h.astype(mxu_dtype),
        dimension_numbers=(((1,), (1,)), ((), ())),
        preferred_element_type=jnp.float32)
    ot_ref[...] = (ot + b2t_ref[...]).astype(ot_ref.dtype)


def net_forward(x, w1, b1, w2, b2, *, block_b=4096, mxu_dtype=jnp.bfloat16,
                transposed_output=False):
    """Fused MLP forward.  x: (B, 30) f32 -> (B, 2) f32 (or (2, B) if
    transposed_output=True).

    block_b:   batch tile (rounded to a multiple of 128).  x tiles stream
               through the double-buffered BlockSpec pipeline; weights/biases
               stay VMEM-resident via constant index_maps.
    mxu_dtype: jnp.bfloat16 (default; single-pass MXU, f32 accumulate/bias/out)
               or jnp.float32 for the exact, bit-faithful-to-PyTorch path.
    """
    B = x.shape[0]

    # Tile: multiple of 128, no bigger than needed for B.
    tb = min(_round_up(block_b, 128), _round_up(B, 128))
    # v7x: keep >= ~4 grid steps per TensorCore so the "parallel" batch axis
    # shards evenly across both cores (no effect on 1-TC v5e/v6e).
    ntc = _num_tensorcores()
    if ntc > 1:
        tb = min(tb, max(128, _round_up(pl.cdiv(B, 4 * ntc), 128)))
    grid = int(pl.cdiv(B, tb))   # ragged tail block is masked by Pallas; no jnp.pad

    itemsize = int(jnp.dtype(mxu_dtype).itemsize)
    w1k = w1.astype(mxu_dtype)                                   # (30, 128)
    w2t = jnp.transpose(w2).astype(mxu_dtype)                    # (2, 128)
    b1k = jnp.reshape(b1, (1, HIDDEN_SIZE)).astype(jnp.float32)  # (1, 128)
    b2t = jnp.reshape(b2, (OUTPUT_SIZE, 1)).astype(jnp.float32)  # (2, 1)

    weight_bytes = (INPUT_SIZE * HIDDEN_SIZE * itemsize + HIDDEN_SIZE * 4
                    + OUTPUT_SIZE * HIDDEN_SIZE * itemsize + OUTPUT_SIZE * 4)
    cost = pl.CostEstimate(
        flops=2 * B * (INPUT_SIZE * HIDDEN_SIZE + HIDDEN_SIZE * OUTPUT_SIZE),
        transcendentals=0,
        bytes_accessed=B * (INPUT_SIZE * 4 + OUTPUT_SIZE * 4) + weight_bytes)

    out_t = pl.pallas_call(
        functools.partial(_mlp_kernel, mxu_dtype=mxu_dtype),
        out_shape=jax.ShapeDtypeStruct((OUTPUT_SIZE, B), jnp.float32),
        grid=(grid,),
        in_specs=[
            # Batch-tiled input: streamed, double-buffered by Pallas.
            pl.BlockSpec((tb, INPUT_SIZE), lambda i: (i, 0)),
            # Weights / biases: constant block index -> fetched once, VMEM-resident.
            pl.BlockSpec((INPUT_SIZE, HIDDEN_SIZE), lambda i: (0, 0)),
            pl.BlockSpec((1, HIDDEN_SIZE), lambda i: (0, 0)),
            pl.BlockSpec((OUTPUT_SIZE, HIDDEN_SIZE), lambda i: (0, 0)),
            pl.BlockSpec((OUTPUT_SIZE, 1), lambda i: (0, 0)),
        ],
        # Transposed output block: last dim is the batch tile -> lane-dense stores.
        out_specs=pl.BlockSpec((OUTPUT_SIZE, tb), lambda i: (0, i)),
        compiler_params=pltpu.CompilerParams(
            dimension_semantics=("parallel",)),   # batch tiles across TCs (v7x)
        cost_estimate=cost,
    )(x, w1k, b1k, w2t, b2t)

    if transposed_output:
        return out_t                              # (2, B) — fuse into consumer
    return jnp.transpose(out_t)                   # (B, 2) f32, matches nn.Module


def init_params(key):
    """Deterministic init mimicking nn.Linear's U(-1/sqrt(fan_in), 1/sqrt(fan_in))."""
    k1, k2, k3, k4 = jax.random.split(key, 4)
    bound1 = 1.0 / jnp.sqrt(float(INPUT_SIZE))
    bound2 = 1.0 / jnp.sqrt(float(HIDDEN_SIZE))
    w1 = jax.random.uniform(k1, (INPUT_SIZE, HIDDEN_SIZE), jnp.float32, -bound1, bound1)
    b1 = jax.random.uniform(k2, (1, HIDDEN_SIZE), jnp.float32, -bound1, bound1)
    w2 = jax.random.uniform(k3, (HIDDEN_SIZE, OUTPUT_SIZE), jnp.float32, -bound2, bound2)
    b2 = jax.random.uniform(k4, (1, OUTPUT_SIZE), jnp.float32, -bound2, bound2)
    return w1, b1, w2, b2


def _reference(x, w1, b1, w2, b2):
    hi = jax.lax.Precision.HIGHEST
    h = jnp.maximum(jnp.dot(x, w1, precision=hi) + b1, 0.0)
    return jnp.dot(h, w2, precision=hi) + b2


if __name__ == "__main__":
    key = jax.random.PRNGKey(0)
    kx1, kx2, kx3, kp = jax.random.split(key, 4)
    w1, b1, w2, b2 = init_params(kp)

    # 1) Small batch, exact-f32 MXU path (bit-faithful to the PyTorch module).
    x_small = jax.random.normal(kx1, (8, INPUT_SIZE), jnp.float32)
    ref_small = _reference(x_small, w1, b1, w2, b2)
    out_f32 = jax.block_until_ready(
        net_forward(x_small, w1, b1, w2, b2, mxu_dtype=jnp.float32))
    assert out_f32.shape == (8, OUTPUT_SIZE)
    assert jnp.allclose(out_f32, ref_small, atol=1e-4, rtol=1e-4)

    # Default path: in-kernel bf16 MXU inputs, f32 accumulate / bias / output.
    out_bf16 = jax.block_until_ready(net_forward(x_small, w1, b1, w2, b2))
    assert out_bf16.shape == (8, OUTPUT_SIZE)
    assert jnp.allclose(out_bf16, ref_small, atol=3e-2, rtol=3e-2)

    # 2) Non-multiple batch with a small tile -> multi-step grid + masked tail
    #    block (no jnp.pad copy of x).
    x_med = jax.random.normal(kx2, (300, INPUT_SIZE), jnp.float32)
    ref_med = _reference(x_med, w1, b1, w2, b2)
    out_med = jax.block_until_ready(
        net_forward(x_med, w1, b1, w2, b2, block_b=128))
    assert out_med.shape == (300, OUTPUT_SIZE)
    assert jnp.allclose(out_med, ref_med, atol=3e-2, rtol=3e-2)

    # 3) Larger batch: default tile + v7x grid clamp; transposed (2, B) output
    #    consumed directly (skips the trailing transpose launch).
    x_big = jax.random.normal(kx3, (1024, INPUT_SIZE), jnp.float32)
    ref_big = _reference(x_big, w1, b1, w2, b2)
    out_big_t = jax.block_until_ready(
        net_forward(x_big, w1, b1, w2, b2, transposed_output=True))
    assert out_big_t.shape == (OUTPUT_SIZE, 1024)
    assert jnp.allclose(jnp.transpose(out_big_t), ref_big, atol=3e-2, rtol=3e-2)

    print("KERNEL_OK")
</pallas_src>

<mosaic_0001>
module attributes {stable_mosaic.version = 11 : i64} {
  func.func @_mlp_kernel(%arg0: i32, %arg1: memref<128x30xf32, #tpu.memory_space<vmem>>, %arg2: memref<30x128xf32, #tpu.memory_space<vmem>>, %arg3: memref<1x128xf32, #tpu.memory_space<vmem>>, %arg4: memref<2x128xf32, #tpu.memory_space<vmem>>, %arg5: memref<2x1xf32, #tpu.memory_space<vmem>>, %arg6: memref<2x128xf32, #tpu.memory_space<vmem>>) attributes {dimension_semantics = [#tpu.dimension_semantics<parallel>], iteration_bounds = array<i64: 1>, scalar_prefetch = 0 : i64, scratch_operands = 0 : i64, tpu.core_type = #tpu.core_type<tc>, window_params = [{transform_indices = @transform_0, window_bounds = array<i64: 128, 30>}, {pipeline_mode = #tpu.pipeline_mode<synchronous>, transform_indices = @transform_1, window_bounds = array<i64: 30, 128>}, {pipeline_mode = #tpu.pipeline_mode<synchronous>, transform_indices = @transform_2, window_bounds = array<i64: 1, 128>}, {pipeline_mode = #tpu.pipeline_mode<synchronous>, transform_indices = @transform_3, window_bounds = array<i64: 2, 128>}, {pipeline_mode = #tpu.pipeline_mode<synchronous>, transform_indices = @transform_4, window_bounds = array<i64: 2, 1>}, {transform_indices = @transform_5, window_bounds = array<i64: 2, 128>}]} {
    %c0 = arith.constant 0 : index
    %c0_0 = arith.constant 0 : index
    %0 = vector.load %arg1[%c0, %c0_0] : memref<128x30xf32, #tpu.memory_space<vmem>>, vector<128x30xf32>
    %c0_1 = arith.constant 0 : index
    %c0_2 = arith.constant 0 : index
    %1 = vector.load %arg2[%c0_1, %c0_2] : memref<30x128xf32, #tpu.memory_space<vmem>>, vector<30x128xf32>
    %cst = arith.constant dense<0.000000e+00> : vector<128x128xf32>
    %2 = tpu.matmul %0, %1, %cst {dimension_numbers = #tpu.dot_dimension_numbers<[1], [0], [0], [1], [0, 0, 1, 1], [], []>} : vector<128x30xf32>, vector<30x128xf32>, vector<128x128xf32> -> vector<128x128xf32>
    %c0_3 = arith.constant 0 : index
    %c0_4 = arith.constant 0 : index
    %3 = vector.load %arg3[%c0_3, %c0_4] : memref<1x128xf32, #tpu.memory_space<vmem>>, vector<1x128xf32>
    %4 = vector.broadcast %3 : vector<1x128xf32> to vector<128x128xf32>
    %5 = arith.addf %2, %4 : vector<128x128xf32>
    %cst_5 = arith.constant 0.000000e+00 : f32
    %6 = vector.broadcast %cst_5 : f32 to vector<128x128xf32>
    %7 = arith.maximumf %5, %6 : vector<128x128xf32>
    %c0_6 = arith.constant 0 : index
    %c0_7 = arith.constant 0 : index
    %8 = vector.load %arg4[%c0_6, %c0_7] : memref<2x128xf32, #tpu.memory_space<vmem>>, vector<2x128xf32>
    %cst_8 = arith.constant dense<0.000000e+00> : vector<2x128xf32>
    %9 = tpu.matmul %8, %7, %cst_8 {dimension_numbers = #tpu.dot_dimension_numbers<[1], [1], [0], [0], [0, 0, 1, 0], [], []>} : vector<2x128xf32>, vector<128x128xf32>, vector<2x128xf32> -> vector<2x128xf32>
    %c0_9 = arith.constant 0 : index
    %c0_10 = arith.constant 0 : index
    %10 = vector.load %arg5[%c0_9, %c0_10] : memref<2x1xf32, #tpu.memory_space<vmem>>, vector<2x1xf32>
    %11 = vector.broadcast %10 : vector<2x1xf32> to vector<2x128xf32>
    %12 = arith.addf %9, %11 : vector<2x128xf32>
    %c0_11 = arith.constant 0 : index
    %c0_12 = arith.constant 0 : index
    %13 = vector.load %arg6[%c0_11, %c0_12] : memref<2x128xf32, #tpu.memory_space<vmem>>, vector<2x128xf32>
    tpu.vector_store %arg6[%c0_11, %c0_12], %12 {strides = array<i32>} : memref<2x128xf32, #tpu.memory_space<vmem>>, vector<2x128xf32>,
    return
  }
  func.func @transform_0(%arg0: i32) -> (i32, i32) {
    %c0_i32 = arith.constant 0 : i32
    %c0_i32_0 = arith.constant 0 : i32
    return %arg0, %c0_i32 : i32, i32
  }
  func.func @transform_1(%arg0: i32) -> (i32, i32) {
    %c0_i32 = arith.constant 0 : i32
    %c0_i32_0 = arith.constant 0 : i32
    %c0_i32_1 = arith.constant 0 : i32
    return %c0_i32, %c0_i32_0 : i32, i32
  }
  func.func @transform_2(%arg0: i32) -> (i32, i32) {
    %c0_i32 = arith.constant 0 : i32
    %c0_i32_0 = arith.constant 0 : i32
    %c0_i32_1 = arith.constant 0 : i32
    return %c0_i32, %c0_i32_0 : i32, i32
  }
  func.func @transform_3(%arg0: i32) -> (i32, i32) {
    %c0_i32 = arith.constant 0 : i32
    %c0_i32_0 = arith.constant 0 : i32
    %c0_i32_1 = arith.constant 0 : i32
    return %c0_i32, %c0_i32_0 : i32, i32
  }
  func.func @transform_4(%arg0: i32) -> (i32, i32) {
    %c0_i32 = arith.constant 0 : i32
    %c0_i32_0 = arith.constant 0 : i32
    %c0_i32_1 = arith.constant 0 : i32
    return %c0_i32, %c0_i32_0 : i32, i32
  }
  func.func @transform_5(%arg0: i32) -> (i32, i32) {
    %c0_i32 = arith.constant 0 : i32
    %c0_i32_0 = arith.constant 0 : i32
    return %c0_i32, %arg0 : i32, i32
  }
}

</mosaic_0001>

<bundles_post_ra>
// kernel: tpu_custom_call.1
= control target key start
LH: loop header
LB: loop body
LE: loop exit
PB: predicated region body
PF: predicated region fallthrough
CT: control target
= control target key end

     0   :  { %10 = vsyncpa [#allocation3], 0  ;;  %s438_s0 = inlined_call_operand.hbm [shape: f32[8,30], index: 0, kind: input, shape index: {}]   ;;  %s439_s1 = inlined_call_operand.hbm [shape: f32[30,128], index: 1, kind: input, shape index: {}]   ;;  %s440_s2 = inlined_call_operand.vmem [shape: f32[1,128], index: 2, kind: input, shape index: {}]   ;;  %s441_s3 = inlined_call_operand.vmem [shape: f32[2,128], index: 3, kind: input, shape index: {}]   ;;  %s442_s4 = inlined_call_operand.vmem [shape: f32[2,1], index: 4, kind: input, shape index: {}]   ;;  %s443_s5 = inlined_call_operand.hbm [shape: f32[2,8], index: 5, kind: output, shape index: {}]  }
   0x1   :  { %11 = vsyncpa [#allocation6], 0 }
   0x2   :  { %12 = vsyncpa [#allocation4], 0 }
   0x3   :  { %16 = vsyncadd [#allocation3], 1920  ;;  %s17_s20 = sshll.u32 %s438_s0, 4  ;;  %s368_s21 = smov [#allocation2]   ;;  %s18_s20 = int_to_ptr.hbm [resolvable:$true] %s17_s20 }
   0x4   :  { %s19_s22 = sshll.u32 %s368_s21, 4  ;;  %s30_s25 = sshll.u32 %s439_s1, 4  ;;  %s20_s22 = int_to_ptr.vmem [resolvable:$true] %s19_s22  ;;  %s31_s25 = int_to_ptr.hbm [resolvable:$true] %s30_s25 }
   0x5   :  { %s369_s26 = smov 128   ;;  %s370_s27 = smov 8  }
   0x6   :  { %25 = dma.hbm_to_vmem [thread:$0]  %s18_s20, 128, %s20_s22, [#allocation3], %s369_s26, %s369_s26, %s370_s27  }
   0x7   :  { %s371_s28 = smov [#allocation5]  }
   0x8   :  { %s32_s29 = sshll.u32 %s371_s28, 4  ;;  %s33_s29 = int_to_ptr.vmem [resolvable:$true] %s32_s29 }
   0x9   :  { %38 = dma.hbm_to_vmem [thread:$0]  %s31_s25, 512, %s33_s29, [#allocation6], %s369_s26, %s369_s26, %s370_s27  }
   0xa   :  { %362 = dma.done.wait [#allocation3], 2048  }
   0xb   :  { %363 = vsyncadd [#allocation3], 4294965248 }
   0xc   :  { %364 = dma.done.wait [#allocation6], 512  }
   0xd   :  { %365 = vsyncadd [#allocation6], 4294966784  ;;  %vm126_vm0 = vcmask 1045504   ;;  %v72_v0 = vld [vmem:[#allocation5 + $0x18] sm:$0x3f]  ;;  %v71_v1 = vld [vmem:[#allocation5 + $0x10] sm:$0xff] }
   0xe   :  { %274 = vmatpush.msk.msra.mxu2 %vm126_vm0, %v72_v0  ;;  %275 = vmatpush.msk.msra.mxu3 %vm126_vm0, %v72_v0  ;;  %v70_v2 = vld [vmem:[#allocation5 + $0x8] sm:$0xff]  ;;  %v69_v3 = vld [vmem:[#allocation5] sm:$0xff]  ;;  %v59_v4 = vld [vmem:[#allocation2 + $0x30] sm:$0xff]  ;;  %vm77_vm1 = vcmask 244736   ;;  %v372_v58 = vmov 0   ;;  %s373_s7 = smov [#allocation7]  }
   0xf   :  { %257 = vmatpush.msk.msra.mxu0 %vm126_vm0, %v72_v0  ;;  %v65_v5 = vld [vmem:[#allocation2 + $0x60] sm:$0xff]  ;;  %v60_v7 = vld [vmem:[#allocation2 + $0x38] sm:$0xff]  ;;  %v66_v8 = vld [vmem:[#allocation2 + $0x68] sm:$0xff]  ;;  %288 = vset.pattern.permute.xlu0 %v372_v58  ;;  %s244_s8 = sshll.u32 %s373_s7, 4  ;;  %s246_s11 = sshll.u32 %s443_s5, 4  ;;  %s245_s8 = int_to_ptr.vmem [resolvable:$true] %s244_s8  ;;  %s247_s11 = int_to_ptr.hbm [resolvable:$true] %s246_s11 }
  0x10   :  { %276 = vmatpush.msra.mxu2 %v71_v1  ;;  %277 = vmatpush.msra.mxu3 %v71_v1  ;;  %v53_v6 = vld [vmem:[#allocation2] sm:$0xff]  ;;  %v54_v9 = vld [vmem:[#allocation2 + $0x8] sm:$0xff]  ;;  %v67_v11 = vld [vmem:[#allocation2 + $0x70] sm:$0xff] }
  0x11   :  { %143 = vmatpush.msra.mxu0 %v71_v1  ;;  %v61_v10 = vld [vmem:[#allocation2 + $0x40] sm:$0xff]  ;;  %v55_v12 = vld [vmem:[#allocation2 + $0x10] sm:$0xff]  ;;  %v62_v13 = vld [vmem:[#allocation2 + $0x48] sm:$0xff] }
  0x12   :  { %278 = vmatpush.msra.mxu2 %v70_v2  ;;  %279 = vmatpush.msra.mxu3 %v70_v2  ;;  %v68_v14 = vld [vmem:[#allocation2 + $0x78] sm:$0xff]  ;;  %v63_v16 = vld [vmem:[#allocation2 + $0x50] sm:$0xff]  ;;  %v57_v17 = vld [vmem:[#allocation2 + $0x20] sm:$0xff] }
  0x13   :  { %144 = vmatpush.msra.mxu0 %v70_v2  ;;  %v56_v15 = vld [vmem:[#allocation2 + $0x18] sm:$0xff]  ;;  %v58_v19 = vld [vmem:[#allocation2 + $0x28] sm:$0xff]  ;;  %v289_v28 = vld [vmem:[%s440_s2] ss:$0 sm:$0xff] }
  0x14   :  { %280 = vmatpush.msra.mxu2 %v69_v3  ;;  %281 = vmatpush.msra.mxu3 %v69_v3  ;;  %v64_v18 = vld [vmem:[#allocation2 + $0x58] sm:$0xff]  ;;  %v212_v56 = vld [vmem:[%s442_s4] sm:$0x3] }
  0x15   :  { %264 = vmatmul.msk.f32.vlgmr.msra.gmra.mxu2 %vm77_vm1, %v59_v4  ;;  %270 = vmatmul.msk.f32.vlgmr.msra.gmra.mxu3 %vm77_vm1, %v65_v5 }
  0x16   :  { %145 = vmatpush.msra.mxu0 %v69_v3  ;;  %215 = vperm.xlu0 %288, %v212_v56  }
  0x17   :  { %258 = vmatmul.msk.f32.vlgmr.msra.gmra.mxu0 %vm77_vm1, %v53_v6 }
  0x1d   :  { %265 = vmatmul.msk.f32.gmra.mxu2 %vm77_vm1, %v60_v7  ;;  %271 = vmatmul.msk.f32.gmra.mxu3 %vm77_vm1, %v66_v8  ;;  %v211_v7 = vld [vmem:[%s441_s3] sm:$0x3] }
  0x1f   :  { %259 = vmatmul.msk.f32.gmra.mxu0 %vm77_vm1, %v54_v9 }
  0x25   :  { %266 = vmatmul.msk.f32.gmra.mxu2 %vm77_vm1, %v61_v10  ;;  %272 = vmatmul.msk.f32.gmra.mxu3 %vm77_vm1, %v67_v11 }
  0x27   :  { %260 = vmatmul.msk.f32.gmra.mxu0 %vm77_vm1, %v55_v12 }
  0x2d   :  { %267 = vmatmul.msk.f32.gmra.mxu2 %vm77_vm1, %v62_v13  ;;  %273 = vmatmul.msk.f32.gmra.mxu3 %vm77_vm1, %v68_v14 }
  0x2f   :  { %261 = vmatmul.msk.f32.gmra.mxu0 %vm77_vm1, %v56_v15 }
  0x35   :  { %268 = vmatmul.msk.f32.gmra.mxu2 %vm77_vm1, %v63_v16 }
  0x37   :  { %262 = vmatmul.msk.f32.gmra.mxu0 %vm77_vm1, %v57_v17 }
  0x3d   :  { %269 = vmatmul.msk.f32.gmra.mxu2 %vm77_vm1, %v64_v18 }
  0x3f   :  { %263 = vmatmul.msk.f32.gmra.mxu0 %vm77_vm1, %v58_v19 }
  0x88   :  { %v216_v8 = vpop.permute.xlu0 %215 }
  0x94   :  { %v147_v22 = vpop.f32.mrf.mxu0 }
  0x95   :  { %v148_v4 = vadd.f32 %v289_v28, %v147_v22 }
  0x97   :  { %v195_v6 = vmax.f32 %v148_v4, 0.0 }
  0x98   :  { %v165_v20 = vpop.f32.mrf.mxu2  ;;  %v183_v21 = vpop.f32.mrf.mxu3 }
  0x99   :  { %v184_v38 = vadd.f32 %v289_v28, %v183_v21  ;;  %v166_v54 = vadd.f32 %v289_v28, %v165_v20 }
  0x9b   :  { %v207_v41 = vmax.f32 %v184_v38, 0.0  ;;  %v201_v59 = vmax.f32 %v166_v54, 0.0 }
  0x9c   :  { %v150_v27 = vpop.f32.mrf.mxu0 }
  0x9d   :  { %v151_v2 = vadd.f32 %v289_v28, %v150_v27 }
  0x9f   :  { %v196_v5 = vmax.f32 %v151_v2, 0.0 }
  0xa0   :  { %v168_v23 = vpop.f32.mrf.mxu2  ;;  %v186_v24 = vpop.f32.mrf.mxu3 }
  0xa1   :  { %v187_v35 = vadd.f32 %v289_v28, %v186_v24  ;;  %v169_v51 = vadd.f32 %v289_v28, %v168_v23 }
  0xa3   :  { %v208_v39 = vmax.f32 %v187_v35, 0.0  ;;  %v202_v55 = vmax.f32 %v169_v51, 0.0 }
  0xa4   :  { %v153_v34 = vpop.f32.mrf.mxu0 }
  0xa5   :  { %v154_v0 = vadd.f32 %v289_v28, %v153_v34 }
  0xa7   :  { %v197_v3 = vmax.f32 %v154_v0, 0.0 }
  0xa8   :  { %v171_v25 = vpop.f32.mrf.mxu2  ;;  %v189_v26 = vpop.f32.mrf.mxu3 }
  0xa9   :  { %v190_v32 = vadd.f32 %v289_v28, %v189_v26  ;;  %v172_v49 = vadd.f32 %v289_v28, %v171_v25 }
  0xab   :  { %v209_v36 = vmax.f32 %v190_v32, 0.0  ;;  %v203_v52 = vmax.f32 %v172_v49, 0.0 }
  0xac   :  { %v156_v40 = vpop.f32.mrf.mxu0 }
  0xad   :  { %v157_v62 = vadd.f32 %v289_v28, %v156_v40 }
  0xaf   :  { %v198_v1 = vmax.f32 %v157_v62, 0.0 }
  0xb0   :  { %v174_v29 = vpop.f32.mrf.mxu2  ;;  %v192_v30 = vpop.f32.mrf.mxu3 }
  0xb1   :  { %v193_v31 = vadd.f32 %v289_v28, %v192_v30  ;;  %v175_v46 = vadd.f32 %v289_v28, %v174_v29 }
  0xb3   :  { %v210_v33 = vmax.f32 %v193_v31, 0.0  ;;  %v204_v50 = vmax.f32 %v175_v46, 0.0 }
  0xb4   :  { %v159_v48 = vpop.f32.mrf.mxu0 }
  0xb5   :  { %218 = vmatpush.xpose.msra.mxu1 %v210_v33  ;;  %v160_v61 = vadd.f32 %v289_v28, %v159_v48 }
  0xb7   :  { %v199_v63 = vmax.f32 %v160_v61, 0.0 }
  0xb8   :  { %v177_v37 = vpop.f32.mrf.mxu2 }
  0xb9   :  { %219 = vmatpush.xpose.msra.mxu1 %v209_v36  ;;  %v178_v44 = vadd.f32 %v289_v28, %v177_v37 }
  0xbb   :  { %v205_v47 = vmax.f32 %v178_v44, 0.0 }
  0xbc   :  { %v162_v53 = vpop.f32.mrf.mxu0 }
  0xbd   :  { %220 = vmatpush.xpose.msra.mxu1 %v208_v39  ;;  %v163_v57 = vadd.f32 %v289_v28, %v162_v53 }
  0xbf   :  { %v200_v60 = vmax.f32 %v163_v57, 0.0 }
  0xc0   :  { %v180_v42 = vpop.f32.mrf.mxu2 }
  0xc1   :  { %v181_v43 = vadd.f32 %v289_v28, %v180_v42  ;;  %221 = vmatpush.xpose.msra.mxu1 %v207_v41 }
  0xc3   :  { %v206_v45 = vmax.f32 %v181_v43, 0.0 }
  0xc5   :  { %222 = vmatpush.xpose.msra.mxu1 %v206_v45 }
  0xc9   :  { %223 = vmatpush.xpose.msra.mxu1 %v205_v47 }
  0xcd   :  { %224 = vmatpush.xpose.msra.mxu1 %v204_v50 }
  0xd1   :  { %225 = vmatpush.xpose.msra.mxu1 %v203_v52 }
  0xd5   :  { %226 = vmatpush.xpose.msra.mxu1 %v202_v55 }
  0xd9   :  { %227 = vmatpush.xpose.msra.mxu1 %v201_v59 }
  0xdd   :  { %228 = vmatpush.xpose.msra.mxu1 %v200_v60 }
  0xe1   :  { %229 = vmatpush.xpose.msra.mxu1 %v199_v63 }
  0xe5   :  { %230 = vmatpush.xpose.msra.mxu1 %v198_v1 }
  0xe9   :  { %231 = vmatpush.xpose.msra.mxu1 %v197_v3 }
  0xed   :  { %232 = vmatpush.xpose.msra.mxu1 %v196_v5 }
  0xf1   :  { %233 = vmatpush.xpose.msra.mxu1 %v195_v6 }
  0xf4   :  { %234 = vmatmul.f32.vlgmr.msra.gmra.mxu1 %v211_v7 }
 0x171   :  { %v235_v9 = vpop.f32.mrf.mxu1 }
 0x172   :  { %v236_v10 = vadd.f32 %v235_v9, %v216_v8 }
 0x174   :  { %238 = vst [vmem:[#allocation7] sm:$0x3] %v236_v10 }
 0x175   :  { %249 = dma.vmem_to_hbm [thread:$0]  %s245_s8, 32, %s247_s11, [#allocation4]  }
 0x176   :  { %366 = dma.done.wait [#allocation4], 32  }
 0x177   :  { %367 = vsyncadd [#allocation4], 4294967264 }
 0x178   :  { %254 = vsyncpa [#allocation3], 1 }
 0x179   :  { %255 = vsyncpa [#allocation6], 1 }
 0x17a   :  { %256 = vsyncpa [#allocation4], 1 }

</bundles_post_ra>
